<compile_context>
chip_gen: v5e
topology: v5e:2x2
jax: 0.10.0
libtpu: 0.0.40
codegen_flags: <defaults>
</compile_context>

<pallas_src>
import functools

import jax
import jax.numpy as jnp
from jax.experimental import pallas as pl
from jax.experimental.pallas import tpu as pltpu


LANE = 128


def _round_up(x, m):
    return ((x + m - 1) // m) * m


# ----------------------------------------------------------------------------
# Pallas kernels
# ----------------------------------------------------------------------------
def gru_t0_packed_kernel(gid_ref, x_ref, w_ref, b_ref, out_ref, *, e):
    """t=0 GRU output (h0==0) for one (block_n, E) row tile, packed gates.

    Requires 3*e <= 128.
    w_ref (E, 128): lanes [0,e)=W_ir^T, [e,2e)=W_iz^T, [2e,3e)=W_in^T, rest 0.
    b_ref (8, 128): row 0 = packed pre-activation bias
                    (r: b_ir+b_hr | z: b_iz+b_hz | n: b_in | 0),
                    row 1 = b_hn at lanes [0,e), rest 0.
    gid_ref (scalar prefetch) is consumed only by the index_maps.
    """
    del gid_ref
    x = x_ref[...].astype(w_ref.dtype)
    b = b_ref[...]
    # One lane-dense MXU pass instead of three E-wide ones.
    s = jnp.dot(x, w_ref[...], preferred_element_type=jnp.float32)   # (bn, 128)
    pre = s + b[0:1, :]
    sg = jax.nn.sigmoid(pre)              # r at lanes [0,e), z at lanes [e,2e)
    r = sg[:, 0:e]
    z = sg[:, e:2 * e]
    n = jnp.tanh(pre[:, 2 * e:3 * e] + r * b[1:2, 0:e])
    out_ref[...] = ((1.0 - z) * n).astype(out_ref.dtype)


def gru_t0_pergate_kernel(gid_ref, x_ref, wr_ref, wz_ref, wn_ref, b_ref, out_ref):
    """Fallback (3E > 128): per-gate matmuls, no lane-axis slicing of weights.

    b_ref rows: 0 = b_ir + b_hr, 1 = b_iz + b_hz, 2 = b_in, 3 = b_hn.
    """
    del gid_ref
    x = x_ref[...].astype(wr_ref.dtype)
    b = b_ref[...]
    r = jax.nn.sigmoid(
        jnp.dot(x, wr_ref[...], preferred_element_type=jnp.float32) + b[0:1, :])
    z = jax.nn.sigmoid(
        jnp.dot(x, wz_ref[...], preferred_element_type=jnp.float32) + b[1:2, :])
    n = jnp.tanh(
        jnp.dot(x, wn_ref[...], preferred_element_type=jnp.float32)
        + b[2:3, :] + r * b[3:4, :])
    out_ref[...] = ((1.0 - z) * n).astype(out_ref.dtype)


def scalar_gru_t0_kernel(gid_ref, x_ref, c_ref, out_ref):
    """hidden_size==1 GRU output at t=0 with h0 == 0; purely elementwise.

    c_ref rows (lane-broadcast constants):
      0 = w_ir, 1 = w_iz, 2 = w_in, 3 = b_ir+b_hr, 4 = b_iz+b_hz, 5 = b_in, 6 = b_hn.
    """
    del gid_ref
    x = x_ref[...].astype(jnp.float32)
    c = c_ref[...]
    r = jax.nn.sigmoid(c[0:1, :] * x + c[3:4, :])
    z = jax.nn.sigmoid(c[1:2, :] * x + c[4:5, :])
    n = jnp.tanh(c[2:3, :] * x + c[5:6, :] + r * c[6:7, :])
    out_ref[...] = ((1.0 - z) * n).astype(out_ref.dtype)


# ----------------------------------------------------------------------------
# One-time parameter preparation (hoisted out of the hot path)
# ----------------------------------------------------------------------------
def prepare_params(params, compute_dtype=jnp.float32):
    """Pack the 5 GRUs' weights once. `compute_dtype` pins the MXU input dtype
    (use jnp.bfloat16 on v5e/v6e/v7x for throughput; keep f32 for strict checks).
    """
    emb_keys = ("rnn_ope", "rnn_ma", "rnn_veh")
    sca_keys = ("rnn_proc_time", "rnn_trans_time")
    E = params[emb_keys[0]][0].shape[1]
    packed = 3 * E <= LANE

    def emb_entry(p):
        w_ih = p[0].astype(jnp.float32)
        b_ih = p[2].astype(jnp.float32)
        b_hh = p[3].astype(jnp.float32)
        w_r = jnp.transpose(w_ih[0:E, :])
        w_z = jnp.transpose(w_ih[E:2 * E, :])
        w_n = jnp.transpose(w_ih[2 * E:3 * E, :])
        if packed:
            w = jnp.zeros((E, LANE), jnp.float32)
            w = w.at[:, 0:E].set(w_r)
            w = w.at[:, E:2 * E].set(w_z)
            w = w.at[:, 2 * E:3 * E].set(w_n)
            b = jnp.zeros((8, LANE), jnp.float32)
            b = b.at[0, 0:E].set(b_ih[0:E] + b_hh[0:E])            # r bias
            b = b.at[0, E:2 * E].set(b_ih[E:2 * E] + b_hh[E:2 * E])  # z bias
            b = b.at[0, 2 * E:3 * E].set(b_ih[2 * E:3 * E])        # n input bias
            b = b.at[1, 0:E].set(b_hh[2 * E:3 * E])                # b_hn (scaled by r)
            return (w.astype(compute_dtype), b)
        rows = jnp.stack([
            b_ih[0:E] + b_hh[0:E],
            b_ih[E:2 * E] + b_hh[E:2 * E],
            b_ih[2 * E:3 * E],
            b_hh[2 * E:3 * E],
        ])
        b = jnp.pad(rows, ((0, 4), (0, 0)))
        return (w_r.astype(compute_dtype), w_z.astype(compute_dtype),
                w_n.astype(compute_dtype), b)

    entries = [emb_entry(params[k]) for k in emb_keys]
    if packed:
        emb = {"w": jnp.stack([e[0] for e in entries]),       # (G, E, 128)
               "b": jnp.stack([e[1] for e in entries])}       # (G, 8, 128) f32
    else:
        emb = {"wr": jnp.stack([e[0] for e in entries]),
               "wz": jnp.stack([e[1] for e in entries]),
               "wn": jnp.stack([e[2] for e in entries]),
               "b": jnp.stack([e[3] for e in entries])}

    def sca_entry(p):
        w_ih, _w_hh, b_ih, b_hh = (a.astype(jnp.float32) for a in p)
        wi = w_ih.reshape(3)
        vals = jnp.stack([
            wi[0], wi[1], wi[2],
            b_ih[0] + b_hh[0], b_ih[1] + b_hh[1],
            b_ih[2], b_hh[2],
            jnp.zeros((), jnp.float32),
        ])
        return jnp.broadcast_to(vals[:, None], (8, LANE))

    scalar = {"c": jnp.stack([sca_entry(params[k]) for k in sca_keys])}  # (G,8,128)
    return {"emb": emb, "scalar": scalar}


# ----------------------------------------------------------------------------
# Wrappers (pallas_call + layout plumbing)
# ----------------------------------------------------------------------------
def fused_gru_t0(x_groups, emb_params, block_n_cap=256):
    """t=0 GRU output (h0==0) for several GRUs sharing E, fused into one call.

    x_groups: list of (N_g, E) arrays (flattened batch*entity rows).
    Returns a list of (N_g, E) outputs.
    """
    E = x_groups[0].shape[1]
    dtype = x_groups[0].dtype
    G = len(x_groups)
    use_packed = "w" in emb_params

    # Adaptive row tile: biggest real group, 8-aligned, capped.
    max_rows = max(x.shape[0] for x in x_groups)
    block_n = max(8, min(block_n_cap, _round_up(max_rows, 8)))

    # Pad each group to a multiple of block_n rows, concatenate, and build the
    # per-block group-id table (scalar prefetch -> data-dependent weight pick).
    padded, gids, offsets, sizes = [], [], [], []
    off = 0
    for g, x in enumerate(x_groups):
        n = x.shape[0]
        nb = max(1, pl.cdiv(n, block_n))
        n_pad = nb * block_n
        padded.append(jnp.pad(x, ((0, n_pad - n), (0, 0))))
        gids.extend([g] * nb)
        offsets.append(off)
        sizes.append(n)
        off += n_pad
    x_all = jnp.concatenate(padded, axis=0)
    gid = jnp.asarray(gids, jnp.int32)
    num_blocks = len(gids)

    if use_packed:
        kernel = functools.partial(gru_t0_packed_kernel, e=E)
        in_specs = [
            pl.BlockSpec((block_n, E), lambda i, gid: (i, 0)),
            pl.BlockSpec((None, E, LANE), lambda i, gid: (gid[i], 0, 0)),
            pl.BlockSpec((None, 8, LANE), lambda i, gid: (gid[i], 0, 0)),
        ]
        operands = (gid, x_all, emb_params["w"], emb_params["b"])
    else:
        kernel = gru_t0_pergate_kernel
        in_specs = [
            pl.BlockSpec((block_n, E), lambda i, gid: (i, 0)),
            pl.BlockSpec((None, E, E), lambda i, gid: (gid[i], 0, 0)),
            pl.BlockSpec((None, E, E), lambda i, gid: (gid[i], 0, 0)),
            pl.BlockSpec((None, E, E), lambda i, gid: (gid[i], 0, 0)),
            pl.BlockSpec((None, 8, E), lambda i, gid: (gid[i], 0, 0)),
        ]
        operands = (gid, x_all, emb_params["wr"], emb_params["wz"],
                    emb_params["wn"], emb_params["b"])

    out = pl.pallas_call(
        kernel,
        out_shape=jax.ShapeDtypeStruct((x_all.shape[0], E), dtype),
        grid_spec=pltpu.PrefetchScalarGridSpec(
            num_scalar_prefetch=1,
            grid=(num_blocks,),
            in_specs=in_specs,
            out_specs=pl.BlockSpec((block_n, E), lambda i, gid: (i, 0)),
        ),
        compiler_params=pltpu.CompilerParams(
            dimension_semantics=("parallel",)),
    )(*operands)

    return [out[offsets[g]:offsets[g] + sizes[g]] for g in range(G)]


def fused_scalar_gru_t0(x_groups_flat, scalar_params, block_rows_cap=512):
    """t=0 output of hidden_size==1 GRUs (h0==0), fused & lane-dense.

    x_groups_flat: list of 1-D arrays of scalar inputs.
    Returns a list of 1-D outputs of matching lengths.
    """
    dtype = x_groups_flat[0].dtype
    G = len(x_groups_flat)
    ctab = scalar_params["c"]

    # Adaptive tile: enough 128-lane rows for the biggest group, 8-aligned.
    max_n = max(x.shape[0] for x in x_groups_flat)
    block_rows = max(8, min(block_rows_cap, _round_up(pl.cdiv(max_n, LANE), 8)))
    blk = block_rows * LANE

    padded, gids, offsets, sizes = [], [], [], []
    off = 0
    for g, x in enumerate(x_groups_flat):
        n = x.shape[0]
        nb = max(1, pl.cdiv(n, blk))
        n_pad = nb * blk
        padded.append(jnp.pad(x, (0, n_pad - n)).reshape(nb * block_rows, LANE))
        gids.extend([g] * nb)
        offsets.append(off)
        sizes.append(n)
        off += n_pad
    x_all = jnp.concatenate(padded, axis=0)
    gid = jnp.asarray(gids, jnp.int32)
    num_blocks = len(gids)

    out = pl.pallas_call(
        scalar_gru_t0_kernel,
        out_shape=jax.ShapeDtypeStruct(x_all.shape, dtype),
        grid_spec=pltpu.PrefetchScalarGridSpec(
            num_scalar_prefetch=1,
            grid=(num_blocks,),
            in_specs=[
                pl.BlockSpec((block_rows, LANE), lambda i, gid: (i, 0)),
                pl.BlockSpec((None, 8, LANE), lambda i, gid: (gid[i], 0, 0)),
            ],
            out_specs=pl.BlockSpec((block_rows, LANE), lambda i, gid: (i, 0)),
        ),
        compiler_params=pltpu.CompilerParams(
            dimension_semantics=("parallel",)),
    )(gid, x_all, ctab)

    out_flat = out.reshape(-1)
    return [out_flat[offsets[g]:offsets[g] + sizes[g]] for g in range(G)]


def encoding_block_traj_forward(prepared, ope_emb, ma_emb, veh_emb,
                                proc_time_mat, trans_time_mat,
                                block_n_cap=256, scalar_block_rows_cap=512):
    """Matches EncodingBlock_Traj.forward.

    Inputs:  ope_emb [T,B,n_opes,E], ma_emb [T,B,n_mas,E], veh_emb [T,B,n_vehs,E],
             proc_time_mat [T,B,n_opes,n_mas], trans_time_mat [T,B,n_opes,n_vehs]
    Outputs: ([B,n_opes,E], [B,n_mas,E], [B,n_vehs,E],
              [B,n_opes,n_mas], [B,n_opes,n_vehs])
    """
    T, B, n_opes, E = ope_emb.shape
    n_mas = ma_emb.shape[2]
    n_vehs = veh_emb.shape[2]

    # PyTorch keeps only GRU output[:, t==0, :]; with h0 == 0 that equals one
    # (simplified) GRU cell step on x[t==0].
    ope_x0 = ope_emb[0].reshape(B * n_opes, E)
    ma_x0 = ma_emb[0].reshape(B * n_mas, E)
    veh_x0 = veh_emb[0].reshape(B * n_vehs, E)
    proc_x0 = proc_time_mat[0].reshape(-1)
    trans_x0 = trans_time_mat[0].reshape(-1)

    o_ope, o_ma, o_veh = fused_gru_t0(
        [ope_x0, ma_x0, veh_x0], prepared["emb"], block_n_cap=block_n_cap)
    o_proc, o_trans = fused_scalar_gru_t0(
        [proc_x0, trans_x0], prepared["scalar"],
        block_rows_cap=scalar_block_rows_cap)

    return (o_ope.reshape(B, n_opes, E),
            o_ma.reshape(B, n_mas, E),
            o_veh.reshape(B, n_vehs, E),
            o_proc.reshape(B, n_opes, n_mas),
            o_trans.reshape(B, n_opes, n_vehs))


# ----------------------------------------------------------------------------
# Deterministic parameter init (PyTorch GRU default: U(-1/sqrt(H), 1/sqrt(H)))
# ----------------------------------------------------------------------------
def init_gru_params(key, input_size, hidden_size):
    k = 1.0 / float(hidden_size) ** 0.5
    k1, k2, k3, k4 = jax.random.split(key, 4)
    w_ih = jax.random.uniform(k1, (3 * hidden_size, input_size), jnp.float32, -k, k)
    w_hh = jax.random.uniform(k2, (3 * hidden_size, hidden_size), jnp.float32, -k, k)
    b_ih = jax.random.uniform(k3, (3 * hidden_size,), jnp.float32, -k, k)
    b_hh = jax.random.uniform(k4, (3 * hidden_size,), jnp.float32, -k, k)
    return (w_ih, w_hh, b_ih, b_hh)


# ----------------------------------------------------------------------------
# Pure-JAX reference (full GRU over time, then slice t=0) for verification
# ----------------------------------------------------------------------------
def gru_ref_full(x_seq, params):
    w_ih, w_hh, b_ih, b_hh = params
    H = w_hh.shape[1]

    def cell(h, x_t):
        gi = x_t @ w_ih.T + b_ih
        gh = h @ w_hh.T + b_hh
        r = jax.nn.sigmoid(gi[:, :H] + gh[:, :H])
        z = jax.nn.sigmoid(gi[:, H:2 * H] + gh[:, H:2 * H])
        n = jnp.tanh(gi[:, 2 * H:] + r * gh[:, 2 * H:])
        h_new = (1.0 - z) * n + z * h
        return h_new, h_new

    h0 = jnp.zeros((x_seq.shape[0], H), x_seq.dtype)
    _, ys = jax.lax.scan(cell, h0, jnp.swapaxes(x_seq, 0, 1))
    return jnp.swapaxes(ys, 0, 1)            # (N, T, H)


def reference_forward(params, ope_emb, ma_emb, veh_emb, proc_time_mat, trans_time_mat):
    T, B, n_opes, E = ope_emb.shape
    n_mas = ma_emb.shape[2]
    n_vehs = veh_emb.shape[2]
    ope_s = jnp.transpose(ope_emb, (1, 2, 0, 3)).reshape(B * n_opes, T, E)
    ma_s = jnp.transpose(ma_emb, (1, 2, 0, 3)).reshape(B * n_mas, T, E)
    veh_s = jnp.transpose(veh_emb, (1, 2, 0, 3)).reshape(B * n_vehs, T, E)
    proc_s = jnp.transpose(proc_time_mat[..., None], (1, 2, 3, 0, 4)).reshape(B * n_opes * n_mas, T, 1)
    trans_s = jnp.transpose(trans_time_mat[..., None], (1, 2, 3, 0, 4)).reshape(B * n_opes * n_vehs, T, 1)
    o_ope = gru_ref_full(ope_s, params["rnn_ope"]).reshape(B, n_opes, T, E)[:, :, 0, :]
    o_ma = gru_ref_full(ma_s, params["rnn_ma"]).reshape(B, n_mas, T, E)[:, :, 0, :]
    o_veh = gru_ref_full(veh_s, params["rnn_veh"]).reshape(B, n_vehs, T, E)[:, :, 0, :]
    o_proc = gru_ref_full(proc_s, params["rnn_proc_time"]).reshape(B, n_opes, n_mas, T, 1)[:, :, :, 0, 0]
    o_trans = gru_ref_full(trans_s, params["rnn_trans_time"]).reshape(B, n_opes, n_vehs, T, 1)[:, :, :, 0, 0]
    return o_ope, o_ma, o_veh, o_proc, o_trans


# ----------------------------------------------------------------------------
if __name__ == "__main__":
    T, B, n_opes, n_mas, n_vehs, E = 4, 2, 6, 5, 3, 32

    root = jax.random.PRNGKey(0)
    kp1, kp2, kp3, kp4, kp5, kx1, kx2, kx3, kx4, kx5 = jax.random.split(root, 10)

    params = {
        "rnn_ope": init_gru_params(kp1, E, E),
        "rnn_ma": init_gru_params(kp2, E, E),
        "rnn_veh": init_gru_params(kp3, E, E),
        "rnn_proc_time": init_gru_params(kp4, 1, 1),
        "rnn_trans_time": init_gru_params(kp5, 1, 1),
    }

    ope_emb = jax.random.normal(kx1, (T, B, n_opes, E), jnp.float32)
    ma_emb = jax.random.normal(kx2, (T, B, n_mas, E), jnp.float32)
    veh_emb = jax.random.normal(kx3, (T, B, n_vehs, E), jnp.float32)
    proc_time_mat = jax.random.uniform(kx4, (T, B, n_opes, n_mas), jnp.float32)
    trans_time_mat = jax.random.uniform(kx5, (T, B, n_opes, n_vehs), jnp.float32)

    # One-time parameter packing (f32 keeps the strict 1e-5 check valid; use
    # compute_dtype=jnp.bfloat16 in production for MXU/DMA savings).
    prepared = prepare_params(params, compute_dtype=jnp.float32)

    fwd = jax.jit(functools.partial(encoding_block_traj_forward, prepared))
    outs = fwd(ope_emb, ma_emb, veh_emb, proc_time_mat, trans_time_mat)
    outs = jax.block_until_ready(outs)

    refs = reference_forward(params, ope_emb, ma_emb, veh_emb, proc_time_mat, trans_time_mat)
    for o, r in zip(outs, refs):
        assert o.shape == r.shape, (o.shape, r.shape)
        assert float(jnp.max(jnp.abs(o - r))) < 1e-5

    print("KERNEL_OK")
</pallas_src>

<mosaic_0001>
module attributes {stable_mosaic.version = 11 : i64} {
  func.func @gru_t0_packed_kernel(%arg0: i32, %arg1: memref<3xi32, #tpu.memory_space<smem>>, %arg2: memref<16x32xf32, #tpu.memory_space<vmem>>, %arg3: memref<1x32x128xf32, #tpu.memory_space<vmem>>, %arg4: memref<1x8x128xf32, #tpu.memory_space<vmem>>, %arg5: memref<16x32xf32, #tpu.memory_space<vmem>>) attributes {dimension_semantics = [#tpu.dimension_semantics<parallel>], iteration_bounds = array<i64: 3>, scalar_prefetch = 1 : i64, scratch_operands = 0 : i64, tpu.core_type = #tpu.core_type<tc>, window_params = [{transform_indices = @transform_0, window_bounds = array<i64: 16, 32>}, {transform_indices = @transform_1, window_bounds = array<i64: 1, 32, 128>}, {transform_indices = @transform_2, window_bounds = array<i64: 1, 8, 128>}, {transform_indices = @transform_3, window_bounds = array<i64: 16, 32>}]} {
    %c0 = arith.constant 0 : index
    %c0_0 = arith.constant 0 : index
    %0 = vector.load %arg2[%c0, %c0_0] : memref<16x32xf32, #tpu.memory_space<vmem>>, vector<16x32xf32>
    %c0_1 = arith.constant 0 : index
    %c0_2 = arith.constant 0 : index
    %c0_3 = arith.constant 0 : index
    %1 = vector.load %arg4[%c0_1, %c0_2, %c0_3] : memref<1x8x128xf32, #tpu.memory_space<vmem>>, vector<1x8x128xf32>
    %2 = vector.shape_cast %1 : vector<1x8x128xf32> to vector<8x128xf32>
    %c0_4 = arith.constant 0 : index
    %c0_5 = arith.constant 0 : index
    %c0_6 = arith.constant 0 : index
    %3 = vector.load %arg3[%c0_4, %c0_5, %c0_6] : memref<1x32x128xf32, #tpu.memory_space<vmem>>, vector<1x32x128xf32>
    %4 = vector.shape_cast %3 : vector<1x32x128xf32> to vector<32x128xf32>
    %cst = arith.constant dense<0.000000e+00> : vector<16x128xf32>
    %5 = tpu.matmul %0, %4, %cst {dimension_numbers = #tpu.dot_dimension_numbers<[1], [0], [0], [1], [0, 0, 1, 1], [], []>} : vector<16x32xf32>, vector<32x128xf32>, vector<16x128xf32> -> vector<16x128xf32>
    %6 = vector.extract_strided_slice %2 {offsets = [0, 0], sizes = [1, 128], strides = [1, 1]} : vector<8x128xf32> to vector<1x128xf32>
    %7 = vector.broadcast %6 : vector<1x128xf32> to vector<16x128xf32>
    %8 = arith.addf %5, %7 : vector<16x128xf32>
    %9 = arith.negf %8 : vector<16x128xf32>
    %10 = math.exp %9 : vector<16x128xf32>
    %cst_7 = arith.constant 1.000000e+00 : f32
    %11 = vector.broadcast %cst_7 : f32 to vector<16x128xf32>
    %12 = arith.addf %11, %10 : vector<16x128xf32>
    %13 = arith.divf %11, %12 : vector<16x128xf32>
    %14 = vector.extract_strided_slice %13 {offsets = [0, 0], sizes = [16, 32], strides = [1, 1]} : vector<16x128xf32> to vector<16x32xf32>
    %15 = vector.extract_strided_slice %13 {offsets = [0, 32], sizes = [16, 32], strides = [1, 1]} : vector<16x128xf32> to vector<16x32xf32>
    %16 = vector.extract_strided_slice %8 {offsets = [0, 64], sizes = [16, 32], strides = [1, 1]} : vector<16x128xf32> to vector<16x32xf32>
    %17 = vector.extract_strided_slice %2 {offsets = [1, 0], sizes = [1, 32], strides = [1, 1]} : vector<8x128xf32> to vector<1x32xf32>
    %18 = vector.broadcast %17 : vector<1x32xf32> to vector<16x32xf32>
    %19 = arith.mulf %14, %18 : vector<16x32xf32>
    %20 = arith.addf %16, %19 : vector<16x32xf32>
    %21 = math.tanh %20 : vector<16x32xf32>
    %cst_8 = arith.constant 1.000000e+00 : f32
    %22 = vector.broadcast %cst_8 : f32 to vector<16x32xf32>
    %23 = arith.subf %22, %15 : vector<16x32xf32>
    %24 = arith.mulf %23, %21 : vector<16x32xf32>
    %c0_9 = arith.constant 0 : index
    %c0_10 = arith.constant 0 : index
    %25 = vector.load %arg5[%c0_9, %c0_10] : memref<16x32xf32, #tpu.memory_space<vmem>>, vector<16x32xf32>
    tpu.vector_store %arg5[%c0_9, %c0_10], %24 {strides = array<i32>} : memref<16x32xf32, #tpu.memory_space<vmem>>, vector<16x32xf32>,
    return
  }
  func.func @transform_0(%arg0: i32, %arg1: memref<3xi32, #tpu.memory_space<smem>>) -> (i32, i32) {
    %c0_i32 = arith.constant 0 : i32
    %c0_i32_0 = arith.constant 0 : i32
    return %arg0, %c0_i32 : i32, i32
  }
  func.func @transform_1(%arg0: i32, %arg1: memref<3xi32, #tpu.memory_space<smem>>) -> (i32, i32, i32) {
    %0 = arith.index_cast %arg0 : i32 to index
    %1 = memref.load %arg1[%0] : memref<3xi32, #tpu.memory_space<smem>>
    %c0_i32 = arith.constant 0 : i32
    %c0_i32_0 = arith.constant 0 : i32
    %c0_i32_1 = arith.constant 0 : i32
    return %1, %c0_i32, %c0_i32_0 : i32, i32, i32
  }
  func.func @transform_2(%arg0: i32, %arg1: memref<3xi32, #tpu.memory_space<smem>>) -> (i32, i32, i32) {
    %0 = arith.index_cast %arg0 : i32 to index
    %1 = memref.load %arg1[%0] : memref<3xi32, #tpu.memory_space<smem>>
    %c0_i32 = arith.constant 0 : i32
    %c0_i32_0 = arith.constant 0 : i32
    %c0_i32_1 = arith.constant 0 : i32
    return %1, %c0_i32, %c0_i32_0 : i32, i32, i32
  }
  func.func @transform_3(%arg0: i32, %arg1: memref<3xi32, #tpu.memory_space<smem>>) -> (i32, i32) {
    %c0_i32 = arith.constant 0 : i32
    %c0_i32_0 = arith.constant 0 : i32
    return %arg0, %c0_i32 : i32, i32
  }
}

module attributes {stable_mosaic.version = 11 : i64} {
  func.func @scalar_gru_t0_kernel(%arg0: i32, %arg1: memref<2xi32, #tpu.memory_space<smem>>, %arg2: memref<8x128xf32, #tpu.memory_space<vmem>>, %arg3: memref<1x8x128xf32, #tpu.memory_space<vmem>>, %arg4: memref<8x128xf32, #tpu.memory_space<vmem>>) attributes {dimension_semantics = [#tpu.dimension_semantics<parallel>], iteration_bounds = array<i64: 2>, scalar_prefetch = 1 : i64, scratch_operands = 0 : i64, tpu.core_type = #tpu.core_type<tc>, window_params = [{transform_indices = @transform_0, window_bounds = array<i64: 8, 128>}, {transform_indices = @transform_1, window_bounds = array<i64: 1, 8, 128>}, {transform_indices = @transform_2, window_bounds = array<i64: 8, 128>}]} {
    %c0 = arith.constant 0 : index
    %c0_0 = arith.constant 0 : index
    %0 = vector.load %arg2[%c0, %c0_0] : memref<8x128xf32, #tpu.memory_space<vmem>>, vector<8x128xf32>
    %c0_1 = arith.constant 0 : index
    %c0_2 = arith.constant 0 : index
    %c0_3 = arith.constant 0 : index
    %1 = vector.load %arg3[%c0_1, %c0_2, %c0_3] : memref<1x8x128xf32, #tpu.memory_space<vmem>>, vector<1x8x128xf32>
    %2 = vector.shape_cast %1 : vector<1x8x128xf32> to vector<8x128xf32>
    %3 = vector.extract_strided_slice %2 {offsets = [0, 0], sizes = [1, 128], strides = [1, 1]} : vector<8x128xf32> to vector<1x128xf32>
    %4 = vector.broadcast %3 : vector<1x128xf32> to vector<8x128xf32>
    %5 = arith.mulf %4, %0 : vector<8x128xf32>
    %6 = vector.extract_strided_slice %2 {offsets = [3, 0], sizes = [1, 128], strides = [1, 1]} : vector<8x128xf32> to vector<1x128xf32>
    %7 = vector.broadcast %6 : vector<1x128xf32> to vector<8x128xf32>
    %8 = arith.addf %5, %7 : vector<8x128xf32>
    %9 = arith.negf %8 : vector<8x128xf32>
    %10 = math.exp %9 : vector<8x128xf32>
    %cst = arith.constant 1.000000e+00 : f32
    %11 = vector.broadcast %cst : f32 to vector<8x128xf32>
    %12 = arith.addf %11, %10 : vector<8x128xf32>
    %13 = arith.divf %11, %12 : vector<8x128xf32>
    %14 = vector.extract_strided_slice %2 {offsets = [1, 0], sizes = [1, 128], strides = [1, 1]} : vector<8x128xf32> to vector<1x128xf32>
    %15 = vector.broadcast %14 : vector<1x128xf32> to vector<8x128xf32>
    %16 = arith.mulf %15, %0 : vector<8x128xf32>
    %17 = vector.extract_strided_slice %2 {offsets = [4, 0], sizes = [1, 128], strides = [1, 1]} : vector<8x128xf32> to vector<1x128xf32>
    %18 = vector.broadcast %17 : vector<1x128xf32> to vector<8x128xf32>
    %19 = arith.addf %16, %18 : vector<8x128xf32>
    %20 = arith.negf %19 : vector<8x128xf32>
    %21 = math.exp %20 : vector<8x128xf32>
    %cst_4 = arith.constant 1.000000e+00 : f32
    %22 = vector.broadcast %cst_4 : f32 to vector<8x128xf32>
    %23 = arith.addf %22, %21 : vector<8x128xf32>
    %24 = arith.divf %22, %23 : vector<8x128xf32>
    %25 = vector.extract_strided_slice %2 {offsets = [2, 0], sizes = [1, 128], strides = [1, 1]} : vector<8x128xf32> to vector<1x128xf32>
    %26 = vector.broadcast %25 : vector<1x128xf32> to vector<8x128xf32>
    %27 = arith.mulf %26, %0 : vector<8x128xf32>
    %28 = vector.extract_strided_slice %2 {offsets = [5, 0], sizes = [1, 128], strides = [1, 1]} : vector<8x128xf32> to vector<1x128xf32>
    %29 = vector.broadcast %28 : vector<1x128xf32> to vector<8x128xf32>
    %30 = arith.addf %27, %29 : vector<8x128xf32>
    %31 = vector.extract_strided_slice %2 {offsets = [6, 0], sizes = [1, 128], strides = [1, 1]} : vector<8x128xf32> to vector<1x128xf32>
    %32 = vector.broadcast %31 : vector<1x128xf32> to vector<8x128xf32>
    %33 = arith.mulf %13, %32 : vector<8x128xf32>
    %34 = arith.addf %30, %33 : vector<8x128xf32>
    %35 = math.tanh %34 : vector<8x128xf32>
    %cst_5 = arith.constant 1.000000e+00 : f32
    %36 = vector.broadcast %cst_5 : f32 to vector<8x128xf32>
    %37 = arith.subf %36, %24 : vector<8x128xf32>
    %38 = arith.mulf %37, %35 : vector<8x128xf32>
    %c0_6 = arith.constant 0 : index
    %c0_7 = arith.constant 0 : index
    %39 = vector.load %arg4[%c0_6, %c0_7] : memref<8x128xf32, #tpu.memory_space<vmem>>, vector<8x128xf32>
    tpu.vector_store %arg4[%c0_6, %c0_7], %38 {strides = array<i32>} : memref<8x128xf32, #tpu.memory_space<vmem>>, vector<8x128xf32>,
    return
  }
  func.func @transform_0(%arg0: i32, %arg1: memref<2xi32, #tpu.memory_space<smem>>) -> (i32, i32) {
    %c0_i32 = arith.constant 0 : i32
    %c0_i32_0 = arith.constant 0 : i32
    return %arg0, %c0_i32 : i32, i32
  }
  func.func @transform_1(%arg0: i32, %arg1: memref<2xi32, #tpu.memory_space<smem>>) -> (i32, i32, i32) {
    %0 = arith.index_cast %arg0 : i32 to index
    %1 = memref.load %arg1[%0] : memref<2xi32, #tpu.memory_space<smem>>
    %c0_i32 = arith.constant 0 : i32
    %c0_i32_0 = arith.constant 0 : i32
    %c0_i32_1 = arith.constant 0 : i32
    return %1, %c0_i32, %c0_i32_0 : i32, i32, i32
  }
  func.func @transform_2(%arg0: i32, %arg1: memref<2xi32, #tpu.memory_space<smem>>) -> (i32, i32) {
    %c0_i32 = arith.constant 0 : i32
    %c0_i32_0 = arith.constant 0 : i32
    return %arg0, %c0_i32 : i32, i32
  }
}

</mosaic_0001>

<bundles_post_ra>
// kernel: squeeze.6
= control target key start
LH: loop header
LB: loop body
LE: loop exit
PB: predicated region body
PF: predicated region fallthrough
CT: control target
= control target key end

     0   :  { %vm3_vm0 = vcmask 261120   ;;  %s34_s0 = inlined_call_operand.vmem [shape: f32[1,2,5,32], index: 0, kind: input, shape index: {}]   ;;  %s35_s1 = inlined_call_operand.vmem [shape: f32[10,32], index: 1, kind: output, shape index: {}]  }
   0x1   :  { %v2_v0 = vld [vmem:[%s34_s0] sm:$0x1f]   ;;  %v10_v1 = vld [vmem:[%s34_s0 + $0x8] sm:$0x1f]  }
   0x2   :  { %4 = vst.msk [vmem:[%s35_s1] sm:$0x1f] %vm3_vm0, %v2_v0  }
   0x3   :  { %11 = vst.msk [vmem:[%s35_s1 + $0x5] sm:$0x1f] %vm3_vm0, %v10_v1  }

// kernel: squeeze.5
= control target key start
LH: loop header
LB: loop body
LE: loop exit
PB: predicated region body
PF: predicated region fallthrough
CT: control target
= control target key end

     0   :  { %vm3_vm0 = vcmask 261120   ;;  %s34_s0 = inlined_call_operand.vmem [shape: f32[1,2,6,32], index: 0, kind: input, shape index: {}]   ;;  %s35_s1 = inlined_call_operand.vmem [shape: f32[12,32], index: 1, kind: output, shape index: {}]  }
   0x1   :  { %v2_v0 = vld [vmem:[%s34_s0] sm:$0x3f]   ;;  %v10_v1 = vld [vmem:[%s34_s0 + $0x8] sm:$0x3f]  }
   0x2   :  { %4 = vst.msk [vmem:[%s35_s1] sm:$0x3f] %vm3_vm0, %v2_v0  }
   0x3   :  { %11 = vst.msk [vmem:[%s35_s1 + $0x6] sm:$0x3f] %vm3_vm0, %v10_v1  }

// kernel: squeeze.7
= control target key start
LH: loop header
LB: loop body
LE: loop exit
PB: predicated region body
PF: predicated region fallthrough
CT: control target
= control target key end

     0   :  { %vm11_vm0 = vcmask 261120   ;;  %s42_s0 = inlined_call_operand.vmem [shape: f32[1,2,3,32], index: 0, kind: input, shape index: {}]   ;;  %s43_s1 = inlined_call_operand.vmem [shape: f32[6,32], index: 1, kind: output, shape index: {}]  }
   0x1   :  { %v18_v0 = vld [vmem:[%s42_s0 + $0x4] sm:$0xf]  ;;  %v8_v1 = vld [vmem:[%s42_s0] sm:$0xf] }
   0x2   :  { %7 = vst [vmem:[#allocation0 + $0x8] sm:$0xf] %v18_v0 }
   0x3   :  { %9 = vst [vmem:[#allocation0] sm:$0xf] %v8_v1 }
   0x9   :  { %v14_v2 = vld [vmem:[#allocation0 + $0x8] sm:$0x7]  }
   0xa   :  { %v10_v3 = vld [vmem:[#allocation0] sm:$0x7]   ;;  %19 = vst.msk [vmem:[%s43_s1 + $0x3] sm:$0x7] %vm11_vm0, %v14_v2  }
   0xb   :  { %12 = vst.msk [vmem:[%s43_s1] sm:$0x7] %vm11_vm0, %v10_v3  }

// kernel: squeeze.8
= control target key start
LH: loop header
LB: loop body
LE: loop exit
PB: predicated region body
PF: predicated region fallthrough
CT: control target
= control target key end

     0   :  { %s99_s10 = smov 55   ;;  %s100_s11 = smov 45   ;;  %vm3_vm0 = vcmask 39936   ;;  %vm9_vm1 = vcmask 490936   ;;  %vm15_vm2 = vcmask 449936   ;;  %vm21_vm3 = vcmask 408936   ;;  %s159_s0 = inlined_call_operand.vmem [shape: f32[1,2,6,5], index: 0, kind: input, shape index: {}]   ;;  %s160_s1 = inlined_call_operand.vmem [shape: f32[60], index: 1, kind: output, shape index: {}]  }
   0x1   :  { %v77_v0 = vld [vmem:[%s159_s0 + $0xd] sm:$0x1]   ;;  %v79_v1 = vld [vmem:[%s159_s0 + $0xb] sm:$0x1]   ;;  %v81_v2 = vld [vmem:[%s159_s0 + $0x9] sm:$0x1]  }
   0x2   :  { %7 = vrot.lane.b32.xlu0 %v77_v0, %s99_s10  ;;  %19 = vrot.lane.b32.xlu1 %v79_v1, %s100_s11  ;;  %s101_s14 = smov 35   ;;  %v78_v3 = vld [vmem:[%s159_s0 + $0xc] sm:$0x1]   ;;  %v80_v4 = vld [vmem:[%s159_s0 + $0xa] sm:$0x1]   ;;  %s102_s19 = smov 50  }
   0x3   :  { %31 = vrot.lane.b32.xlu2 %v81_v2, %s101_s14  ;;  %s103_s20 = smov 40   ;;  %v82_v5 = vld [vmem:[%s159_s0 + $0x8] sm:$0x1]   ;;  %s104_s23 = smov 30   ;;  %v83_v6 = vld [vmem:[%s159_s0 + $0x5] sm:$0x1]  }
   0x4   :  { %v84_v7 = vld [vmem:[%s159_s0 + $0x4] sm:$0x1]   ;;  %s105_s28 = smov 25   ;;  %s106_s29 = smov 20   ;;  %v85_v8 = vld [vmem:[%s159_s0 + $0x3] sm:$0x1]  }
   0x5   :  { %s107_s3 = smov 15   ;;  %v86_v9 = vld [vmem:[%s159_s0 + $0x2] sm:$0x1]   ;;  %v87_v10 = vld [vmem:[%s159_s0 + $0x1] sm:$0x1]   ;;  %s108_s8 = smov 10  }
   0x6   :  { %s109_s9 = smov 5   ;;  %v2_v11 = vld [vmem:[%s159_s0] sm:$0x1]   ;;  %vm27_vm4 = vcmask 367936   ;;  %vm33_vm5 = vcmask 326936   ;;  %vm39_vm6 = vcmask 285936  }
   0x7   :  { %4 = vst.msk [vmem:[#allocation0] sm:$0x1] %vm3_vm0, %v2_v11   ;;  %vm45_vm7 = vcmask 244936   ;;  %vm51_vm8 = vcmask 203936   ;;  %vm57_vm9 = vcmask 162936   ;;  %vm63_vm10 = vcmask 121936  }
   0x8   :  { %vm69_vm11 = vcmask 80936  }
   0xa   :  { %13 = vrot.lane.b32.xlu0 %v78_v3, %s102_s19  ;;  %25 = vrot.lane.b32.xlu1 %v80_v4, %s103_s20 }
   0xb   :  { %37 = vrot.lane.b32.xlu2 %v82_v5, %s104_s23 }
  0x12   :  { %43 = vrot.lane.b32.xlu0 %v83_v6, %s105_s28  ;;  %49 = vrot.lane.b32.xlu1 %v84_v7, %s106_s29 }
  0x13   :  { %55 = vrot.lane.b32.xlu2 %v85_v8, %s107_s3 }
  0x1a   :  { %61 = vrot.lane.b32.xlu0 %v86_v9, %s108_s8  ;;  %67 = vrot.lane.b32.xlu1 %v87_v10, %s109_s9 }
  0x5d   :  { %v32_v12 = vpop.permute.xlu2 %31  }
  0x65   :  { %v38_v13 = vpop.permute.xlu2 %37  }
  0x6d   :  { %v56_v14 = vpop.permute.xlu2 %55  }
  0x74   :  { %v8_v15 = vpop.permute.xlu0 %7   ;;  %v20_v16 = vpop.permute.xlu1 %19  }
  0x75   :  { %10 = vst.msk [vmem:[#allocation0] sm:$0x1] %vm9_vm1, %v8_v15  }
  0x7c   :  { %v14_v17 = vpop.permute.xlu0 %13   ;;  %v26_v18 = vpop.permute.xlu1 %25  }
  0x7d   :  { %16 = vst.msk [vmem:[#allocation0] sm:$0x1] %vm15_vm2, %v14_v17  }
  0x7e   :  { %22 = vst.msk [vmem:[#allocation0] sm:$0x1] %vm21_vm3, %v20_v16  }
  0x7f   :  { %28 = vst.msk [vmem:[#allocation0] sm:$0x1] %vm27_vm4, %v26_v18  }
  0x80   :  { %34 = vst.msk [vmem:[#allocation0] sm:$0x1] %vm33_vm5, %v32_v12  }
  0x81   :  { %40 = vst.msk [vmem:[#allocation0] sm:$0x1] %vm39_vm6, %v38_v13  }
  0x84   :  { %v44_v19 = vpop.permute.xlu0 %43   ;;  %v50_v20 = vpop.permute.xlu1 %49  }
  0x85   :  { %46 = vst.msk [vmem:[#allocation0] sm:$0x1] %vm45_vm7, %v44_v19  }
  0x86   :  { %52 = vst.msk [vmem:[#allocation0] sm:$0x1] %vm51_vm8, %v50_v20  }
  0x87   :  { %58 = vst.msk [vmem:[#allocation0] sm:$0x1] %vm57_vm9, %v56_v14  }
  0x8c   :  { %v62_v21 = vpop.permute.xlu0 %61   ;;  %v68_v22 = vpop.permute.xlu1 %67  }
  0x8d   :  { %64 = vst.msk [vmem:[#allocation0] sm:$0x1] %vm63_vm10, %v62_v21  }
  0x8e   :  { %70 = vst.msk [vmem:[#allocation0] sm:$0x1] %vm69_vm11, %v68_v22  }
  0x95   :  { %v73_v23 = vld [vmem:[#allocation0] sm:$0x1] }
  0x96   :  { %76 = vst [vmem:[%s160_s1] sm:$0x1] %v73_v23 }

// kernel: squeeze.9
= control target key start
LH: loop header
LB: loop body
LE: loop exit
PB: predicated region body
PF: predicated region fallthrough
CT: control target
= control target key end

     0   :  { %s99_s10 = smov 33   ;;  %s100_s11 = smov 27   ;;  %vm3_vm0 = vcmask 23552   ;;  %vm9_vm1 = vcmask 294152   ;;  %vm15_vm2 = vcmask 269552   ;;  %vm21_vm3 = vcmask 244952   ;;  %s159_s0 = inlined_call_operand.vmem [shape: f32[1,2,6,3], index: 0, kind: input, shape index: {}]   ;;  %s160_s1 = inlined_call_operand.vmem [shape: f32[36], index: 1, kind: output, shape index: {}]  }
   0x1   :  { %v77_v0 = vld [vmem:[%s159_s0 + $0xd] sm:$0x1]   ;;  %v79_v1 = vld [vmem:[%s159_s0 + $0xb] sm:$0x1]   ;;  %v81_v2 = vld [vmem:[%s159_s0 + $0x9] sm:$0x1]  }
   0x2   :  { %7 = vrot.lane.b32.xlu0 %v77_v0, %s99_s10  ;;  %19 = vrot.lane.b32.xlu1 %v79_v1, %s100_s11  ;;  %s101_s14 = smov 21   ;;  %v78_v3 = vld [vmem:[%s159_s0 + $0xc] sm:$0x1]   ;;  %v80_v4 = vld [vmem:[%s159_s0 + $0xa] sm:$0x1]   ;;  %s102_s19 = smov 30  }
   0x3   :  { %31 = vrot.lane.b32.xlu2 %v81_v2, %s101_s14  ;;  %s103_s20 = smov 24   ;;  %v82_v5 = vld [vmem:[%s159_s0 + $0x8] sm:$0x1]   ;;  %s104_s23 = smov 18   ;;  %v83_v6 = vld [vmem:[%s159_s0 + $0x5] sm:$0x1]  }
   0x4   :  { %v84_v7 = vld [vmem:[%s159_s0 + $0x4] sm:$0x1]   ;;  %s105_s28 = smov 15   ;;  %s106_s29 = smov 12   ;;  %v85_v8 = vld [vmem:[%s159_s0 + $0x3] sm:$0x1]  }
   0x5   :  { %s107_s3 = smov 9   ;;  %v86_v9 = vld [vmem:[%s159_s0 + $0x2] sm:$0x1]   ;;  %v87_v10 = vld [vmem:[%s159_s0 + $0x1] sm:$0x1]   ;;  %s108_s8 = smov 6  }
   0x6   :  { %s109_s9 = smov 3   ;;  %v2_v11 = vld [vmem:[%s159_s0] sm:$0x1]   ;;  %vm27_vm4 = vcmask 220352   ;;  %vm33_vm5 = vcmask 195752   ;;  %vm39_vm6 = vcmask 171152  }
   0x7   :  { %4 = vst.msk [vmem:[#allocation0] sm:$0x1] %vm3_vm0, %v2_v11   ;;  %vm45_vm7 = vcmask 146552   ;;  %vm51_vm8 = vcmask 121952   ;;  %vm57_vm9 = vcmask 97352   ;;  %vm63_vm10 = vcmask 72752  }
   0x8   :  { %vm69_vm11 = vcmask 48152  }
   0xa   :  { %13 = vrot.lane.b32.xlu0 %v78_v3, %s102_s19  ;;  %25 = vrot.lane.b32.xlu1 %v80_v4, %s103_s20 }
   0xb   :  { %37 = vrot.lane.b32.xlu2 %v82_v5, %s104_s23 }
  0x12   :  { %43 = vrot.lane.b32.xlu0 %v83_v6, %s105_s28  ;;  %49 = vrot.lane.b32.xlu1 %v84_v7, %s106_s29 }
  0x13   :  { %55 = vrot.lane.b32.xlu2 %v85_v8, %s107_s3 }
  0x1a   :  { %61 = vrot.lane.b32.xlu0 %v86_v9, %s108_s8  ;;  %67 = vrot.lane.b32.xlu1 %v87_v10, %s109_s9 }
  0x5d   :  { %v32_v12 = vpop.permute.xlu2 %31  }
  0x65   :  { %v38_v13 = vpop.permute.xlu2 %37  }
  0x6d   :  { %v56_v14 = vpop.permute.xlu2 %55  }
  0x74   :  { %v8_v15 = vpop.permute.xlu0 %7   ;;  %v20_v16 = vpop.permute.xlu1 %19  }
  0x75   :  { %10 = vst.msk [vmem:[#allocation0] sm:$0x1] %vm9_vm1, %v8_v15  }
  0x7c   :  { %v14_v17 = vpop.permute.xlu0 %13   ;;  %v26_v18 = vpop.permute.xlu1 %25  }
  0x7d   :  { %16 = vst.msk [vmem:[#allocation0] sm:$0x1] %vm15_vm2, %v14_v17  }
  0x7e   :  { %22 = vst.msk [vmem:[#allocation0] sm:$0x1] %vm21_vm3, %v20_v16  }
  0x7f   :  { %28 = vst.msk [vmem:[#allocation0] sm:$0x1] %vm27_vm4, %v26_v18  }
  0x80   :  { %34 = vst.msk [vmem:[#allocation0] sm:$0x1] %vm33_vm5, %v32_v12  }
  0x81   :  { %40 = vst.msk [vmem:[#allocation0] sm:$0x1] %vm39_vm6, %v38_v13  }
  0x84   :  { %v44_v19 = vpop.permute.xlu0 %43   ;;  %v50_v20 = vpop.permute.xlu1 %49  }
  0x85   :  { %46 = vst.msk [vmem:[#allocation0] sm:$0x1] %vm45_vm7, %v44_v19  }
  0x86   :  { %52 = vst.msk [vmem:[#allocation0] sm:$0x1] %vm51_vm8, %v50_v20  }
  0x87   :  { %58 = vst.msk [vmem:[#allocation0] sm:$0x1] %vm57_vm9, %v56_v14  }
  0x8c   :  { %v62_v21 = vpop.permute.xlu0 %61   ;;  %v68_v22 = vpop.permute.xlu1 %67  }
  0x8d   :  { %64 = vst.msk [vmem:[#allocation0] sm:$0x1] %vm63_vm10, %v62_v21  }
  0x8e   :  { %70 = vst.msk [vmem:[#allocation0] sm:$0x1] %vm69_vm11, %v68_v22  }
  0x95   :  { %v73_v23 = vld [vmem:[#allocation0] sm:$0x1] }
  0x96   :  { %76 = vst [vmem:[%s160_s1] sm:$0x1] %v73_v23 }

// kernel: encoding_block_traj_forward.2
= control target key start
LH: loop header
LB: loop body
LE: loop exit
PB: predicated region body
PF: predicated region fallthrough
CT: control target
= control target key end

     0   :  { %s495_s18 = smov [#allocation3]   ;;  %s565_s0 = inlined_call_operand.vmem [shape: s32[3], index: 0, kind: input, shape index: {}]   ;;  %s566_s1 = inlined_call_operand.vmem [shape: f32[48,32], index: 1, kind: input, shape index: {}]   ;;  %s567_s2 = inlined_call_operand.vmem [shape: f32[3,32,128], index: 2, kind: input, shape index: {}]   ;;  %s568_s3 = inlined_call_operand.vmem [shape: f32[3,8,128], index: 3, kind: input, shape index: {}]   ;;  %s569_s4 = inlined_call_operand.vmem [shape: f32[48,32], index: 4, kind: output, shape index: {}]  }
   0x1   :  { %s10_s17 = sshll.u32 %s565_s0, 4  ;;  %s11_s17 = int_to_ptr.vmem [resolvable:$true] %s10_s17 }
   0x2   :  { %13 = dma.vmem_to_smem %s11_s17, 16, %s495_s18, [#allocation2] }
   0x3   :  { %489 = dma.done.wait [#allocation2], 16 }
   0x4   :  { %490 = vsyncadd [#allocation2], 4294967280 }
   0x5   :  { %16 = sfence }
   0x6   :  { %s526_s19 = smov 0  }
   0x7 LB: > { %s532_s20 = sadd.s32 4294967295, %s493_s19   ;;  %p431_p0 = scmp.ge.s32.totalorder %s493_s19, 1  ;;  %s493_s19 = sphi %s526_s19, %s22_s19  }
   0x8   : > { %p174_p1 = scmp.lt.s32.totalorder %s493_s19, 4 }
   0xa   : > { %p175_p2 = pnand %p431_p0, %p174_p1 }
   0xb   : > { %s215_s0 = sld [smem:[#allocation3 + %s532_s20]] (!%p175_p2)  ;;  %s432_s21 = sshll.u32 (!%p175_p2), %s532_s20, 1 }
   0xc   : > { %178 = sbr.rel (%p175_p2) target bundleno = 529 (0x211), region = 32  ;;  %p210_p3 = scmp.lt.s32.totalorder (!%p175_p2), %s432_s21, 5 }
   0xd   : > { %s222_s30 = sld [smem:[#allocation3 + %s532_s20]] (!%p175_p2)  ;;  %s496_s9 = smov (!%p175_p2), 64  }
   0xe   : > { %s497_s10 = smov (!%p175_p2), 96  }
  0x11   : > { %p216_p4 = scmp.lt.s32.totalorder %s215_s0, 2  ;;  %s571_s21 = smov (!%p210_p3, %s432_s21), 5  ;;  %vm242_vm0 = vcmask 261120  }
  0x12   : > { %s433_s26 = sshll.u32 %s571_s21, 3 }
  0x13   : > { %s573_s0 = smov (!%p216_p4, %s215_s0), 2  ;;  %s213_s29 = scalar_lea.vmem %s566_s1, %s433_s26 }
  0x14   : > { %s445_s22 = sshll.u32 %s573_s0, 5  ;;  %v234_v4 = vld [vmem:[%s213_s29] sm:$0xff]  ;;  %v235_v5 = vld [vmem:[%s213_s29 + $0x8] sm:$0xff]  ;;  %p223_p5 = scmp.lt.s32.totalorder %s222_s30, 2 }
  0x15   : > { %s220_s25 = scalar_lea.vmem %s567_s2, %s445_s22  ;;  %s232_s13 = scalar_lea.vmem %s569_s4, %s433_s26 }
  0x16   : > { %v240_v0 = vld [vmem:[%s220_s25 + $0x18] sm:$0xff]  ;;  %v239_v1 = vld [vmem:[%s220_s25 + $0x10] sm:$0xff]  ;;  %v238_v2 = vld [vmem:[%s220_s25 + $0x8] sm:$0xff]  ;;  %s575_s30 = smov (!%p223_p5, %s222_s30), 2 }
  0x17   : > { %261 = vmatpush.msra.mxu0 %v240_v0  ;;  %446 = vmatpush.msra.mxu1 %v240_v0  ;;  %v237_v3 = vld [vmem:[%s220_s25] sm:$0xff]  ;;  %s436_s5 = sshll.u32 %s575_s30, 3 }
  0x18   : > { %s226_s8 = scalar_lea.vmem %s568_s3, %s436_s5 }
  0x19   : > { %262 = vmatpush.msra.mxu0 %v239_v1  ;;  %447 = vmatpush.msra.mxu1 %v239_v1  ;;  %v236_v6 = vld [vmem:[%s226_s8] sm:$0xff] }
  0x1a   : > { %v241_v7 = vperm.slane %v236_v6, 0  ;;  %v310_v29 = vperm.slane %v236_v6, 1 }
  0x1b   : > { %263 = vmatpush.msra.mxu0 %v238_v2  ;;  %448 = vmatpush.msra.mxu1 %v238_v2 }
  0x1d   : > { %264 = vmatpush.msra.mxu0 %v237_v3  ;;  %449 = vmatpush.msra.mxu1 %v237_v3 }
  0x1e   : > { %439 = vmatmul.msk.f32.vlgmr.msra.gmra.mxu0 %vm242_vm0, %v234_v4  ;;  %440 = vmatmul.msk.f32.vlgmr.msra.gmra.mxu1 %vm242_vm0, %v235_v5 }
  0x9b   : > { %v266_v8 = vpop.f32.mrf.mxu0  ;;  %v269_v9 = vpop.f32.mrf.mxu1 }
  0x9c   : > { %v267_v10 = vadd.f32 %v266_v8, %v241_v7  ;;  %v270_v11 = vadd.f32 %v269_v9, %v241_v7 }
  0x9e   : > { %v441_v12 = vmul.f32 -1.442695, %v267_v10  ;;  %v442_v13 = vmul.f32 -1.442695, %v270_v11 }
  0xa0   : > { %461 = vpow2.f32 %v441_v12 }
  0xa1   : > { %463 = vpow2.f32 %v442_v13 }
  0xa6   : > { %v462_v14 = vpop.eup %461 }
  0xa7   : > { %v464_v15 = vpop.eup %463  ;;  %v278_v16 = vadd.f32 1.0, %v462_v14 }
  0xa8   : > { %v279_v17 = vadd.f32 1.0, %v464_v15 }
  0xa9   : > { %465 = vrcp.f32 %v278_v16  ;;  %v291_v23 = vand.u32 2147483648, %v278_v16  ;;  %v289_v26 = vand.u32 2147483647, %v278_v16  ;;  %vm285_vm2 = vweird.f32 %v278_v16 }
  0xaa   : > { %467 = vrcp.f32 %v279_v17  ;;  %vm300_vm4 = vweird.f32 %v279_v17  ;;  %v306_v34 = vand.u32 2147483648, %v279_v17  ;;  %v304_v36 = vand.u32 2147483647, %v279_v17 }
  0xab   : > { %v292_v30 = vor.u32 1.1754944e-38, %v291_v23  ;;  %vm290_vm5 = vcmp.eq.f32.partialorder %v289_v26, 8.507059e+37 }
  0xac   : > { %v307_v38 = vor.u32 1.1754944e-38, %v306_v34  ;;  %vm305_vm8 = vcmp.eq.f32.partialorder %v304_v36, 8.507059e+37 }
  0xaf   : > { %v466_v18 = vpop.eup %465 }
  0xb0   : > { %v468_v19 = vpop.eup %467  ;;  %v281_v20 = vmul.f32 %v466_v18, %v278_v16  ;;  %vm286_vm1 = vweird.f32 %v466_v18 }
  0xb1   : > { %v296_v21 = vmul.f32 %v468_v19, %v279_v17  ;;  %vm287_vm3 = vmor %vm285_vm2, %vm286_vm1  ;;  %vm301_vm6 = vweird.f32 %v468_v19 }
  0xb2   : > { %v282_v22 = vsub.f32 1.0, %v281_v20  ;;  %vm302_vm7 = vmor %vm300_vm4, %vm301_vm6 }
  0xb3   : > { %v297_v24 = vsub.f32 1.0, %v296_v21 }
  0xb4   : > { %v283_v25 = vmul.f32 %v466_v18, %v282_v22 }
  0xb5   : > { %v298_v27 = vmul.f32 %v468_v19, %v297_v24 }
  0xb6   : > { %v284_v28 = vadd.f32 %v466_v18, %v283_v25 }
  0xb7   : > { %v299_v32 = vadd.f32 %v468_v19, %v298_v27 }
  0xb8   : > { %v288_v31 = vsel %vm287_vm3, %v466_v18, %v284_v28 }
  0xb9   : > { %v293_v33 = vsel %vm290_vm5, %v292_v30, %v288_v31  ;;  %v303_v37 = vsel %vm302_vm7, %v468_v19, %v299_v32 }
  0xba   : > { %v311_v35 = vmul.f32 %v310_v29, %v293_v33  ;;  %v308_v39 = vsel %vm305_vm8, %v307_v38, %v303_v37  ;;  %v325_v47 = vsub.f32 1.0, %v293_v33 }
  0xbb   : > { %v312_v40 = vmul.f32 %v310_v29, %v308_v39  ;;  %v326_v50 = vsub.f32 1.0, %v308_v39 }
  0xbc   : > { %315 = vrot.lane.b32.xlu0 %v311_v35, %s496_s9 }
  0xc4   : > { %317 = vrot.lane.b32.xlu0 %v312_v40, %s496_s9 }
 0x12e   : > { %v316_v41 = vpop.permute.xlu0 %315 }
 0x12f   : > { %v321_v42 = vadd.f32 %v316_v41, %v267_v10 }
 0x131   : > { %469 = vtanh.f32 %v321_v42 }
 0x136   : > { %v318_v43 = vpop.permute.xlu0 %317 }
 0x137   : > { %v470_v44 = vpop.eup %469  ;;  %v322_v45 = vadd.f32 %v318_v43, %v270_v11 }
 0x138   : > { %329 = vrot.lane.b32.xlu1 %v470_v44, %s497_s10 }
 0x139   : > { %471 = vtanh.f32 %v322_v45 }
 0x13f   : > { %v472_v46 = vpop.eup %471 }
 0x140   : > { %331 = vrot.lane.b32.xlu1 %v472_v46, %s497_s10 }
 0x1aa   : > { %v330_v48 = vpop.permute.xlu1 %329 }
 0x1ab   : > { %v335_v49 = vmul.f32 %v330_v48, %v325_v47 }
 0x1ad   : > { %339 = vrot.lane.b32.xlu2 %v335_v49, %s497_s10 }
 0x1b2   : > { %v332_v51 = vpop.permute.xlu1 %331 }
 0x1b3   : > { %v336_v52 = vmul.f32 %v332_v51, %v326_v50 }
 0x1b5   : > { %341 = vrot.lane.b32.xlu2 %v336_v52, %s497_s10 }
 0x207   : > { %v340_v53 = vpop.permute.xlu2 %339 }
 0x208   : > { %345 = vst.msk [vmem:[%s232_s13] sm:$0xff] %vm242_vm0, %v340_v53 }
 0x20f   : > { %v342_v54 = vpop.permute.xlu2 %341 }
 0x210   : > { %346 = vst.msk [vmem:[%s232_s13 + $0x8] sm:$0xff] %vm242_vm0, %v342_v54 }
 0x211 PF: > { %s22_s19 = sadd.s32 1, %s493_s19  }
 0x212   : > { %p19_p6 = scmp.ge.s32.totalorder %s22_s19, 5  }
 0x214   :  { %21 = sbr.rel (!%p19_p6) target bundleno = 7 (0x7), region = 68 }

// kernel: encoding_block_traj_forward.3
= control target key start
LH: loop header
LB: loop body
LE: loop exit
PB: predicated region body
PF: predicated region fallthrough
CT: control target
= control target key end

     0   :  { %s349_s15 = smov [#allocation3]   ;;  %s400_s0 = inlined_call_operand.vmem [shape: s32[2], index: 0, kind: input, shape index: {}]   ;;  %s401_s1 = inlined_call_operand.vmem [shape: f32[16,128], index: 1, kind: input, shape index: {}]   ;;  %s402_s2 = inlined_call_operand.vmem [shape: f32[2,8,128], index: 2, kind: input, shape index: {}]   ;;  %s403_s3 = inlined_call_operand.vmem [shape: f32[16,128], index: 3, kind: output, shape index: {}]  }
   0x1   :  { %s9_s14 = sshll.u32 %s400_s0, 4  ;;  %s10_s14 = int_to_ptr.vmem [resolvable:$true] %s9_s14 }
   0x2   :  { %12 = dma.vmem_to_smem %s10_s14, 16, %s349_s15, [#allocation2] }
   0x3   :  { %343 = dma.done.wait [#allocation2], 16 }
   0x4   :  { %344 = vsyncadd [#allocation2], 4294967280 }
   0x5   :  { %15 = sfence }
   0x6   :  { %s373_s16 = smov 0  }
   0x7 LB: > { %s296_s17 = sadd.s32 4294967295, %s347_s16   ;;  %p300_p0 = scmp.ge.s32.totalorder %s347_s16, 1  ;;  %s347_s16 = sphi %s373_s16, %s21_s16  }
   0x8   : > { %p133_p1 = scmp.lt.s32.totalorder %s347_s16, 3 }
   0xa   : > { %p134_p2 = pnand %p300_p0, %p133_p1 }
   0xb   : > { %p158_p3 = scmp.lt.s32.totalorder (!%p134_p2), %s296_s17, 1  ;;  %s162_s0 = sld [smem:[#allocation3 + %s296_s17]] (!%p134_p2) }
   0xc   : > { %137 = sbr.rel (%p134_p2) target bundleno = 71 (0x47), region = 28 }
  0x11   : > { %s405_s17 = smov (!%p158_p3, %s296_s17), 1  ;;  %p163_p4 = scmp.lt.s32.totalorder %s162_s0, 1 }
  0x12   : > { %s301_s18 = sshll.u32 %s405_s17, 3 }
  0x13   : > { %s407_s0 = smov (!%p163_p4, %s162_s0), 1  ;;  %s161_s21 = scalar_lea.vmem %s401_s1, %s301_s18 }
  0x14   : > { %s302_s22 = sshll.u32 %s407_s0, 3  ;;  %v172_v0 = vld [vmem:[%s161_s21] sm:$0xff]  ;;  %s171_s28 = scalar_lea.vmem %s403_s3, %s301_s18 }
  0x15   : > { %s166_s25 = scalar_lea.vmem %s402_s2, %s302_s22 }
  0x16   : > { %v173_v1 = vld [vmem:[%s166_s25] sm:$0xff] }
  0x17   : > { %v174_v2 = vperm.slane %v173_v1, 0  ;;  %v176_v3 = vperm.slane %v173_v1, 3  ;;  %v197_v4 = vperm.slane %v173_v1, 1  ;;  %v199_v5 = vperm.slane %v173_v1, 4 }
  0x18   : > { %v220_v19 = vperm.slane %v173_v1, 2  ;;  %v222_v27 = vperm.slane %v173_v1, 5  ;;  %v224_v32 = vperm.slane %v173_v1, 6 }
  0x19   : > { %v175_v6 = vmul.f32 %v174_v2, %v172_v0  ;;  %v198_v7 = vmul.f32 %v197_v4, %v172_v0 }
  0x1a   : > { %v221_v26 = vmul.f32 %v220_v19, %v172_v0 }
  0x1b   : > { %v177_v8 = vadd.f32 %v176_v3, %v175_v6  ;;  %v200_v9 = vadd.f32 %v199_v5, %v198_v7 }
  0x1c   : > { %v223_v36 = vadd.f32 %v222_v27, %v221_v26 }
  0x1d   : > { %v304_v10 = vmul.f32 -1.442695, %v177_v8  ;;  %v305_v11 = vmul.f32 -1.442695, %v200_v9 }
  0x1f   : > { %317 = vpow2.f32 %v304_v10 }
  0x20   : > { %319 = vpow2.f32 %v305_v11 }
  0x25   : > { %v318_v12 = vpop.eup %317 }
  0x26   : > { %v320_v13 = vpop.eup %319  ;;  %v181_v14 = vadd.f32 1.0, %v318_v12 }
  0x27   : > { %v204_v15 = vadd.f32 1.0, %v320_v13 }
  0x28   : > { %321 = vrcp.f32 %v181_v14  ;;  %v193_v20 = vand.u32 2147483648, %v181_v14  ;;  %vm187_vm0 = vweird.f32 %v181_v14  ;;  %v191_v23 = vand.u32 2147483647, %v181_v14 }
  0x29   : > { %323 = vrcp.f32 %v204_v15  ;;  %vm210_vm3 = vweird.f32 %v204_v15  ;;  %v216_v31 = vand.u32 2147483648, %v204_v15  ;;  %v214_v34 = vand.u32 2147483647, %v204_v15 }
  0x2a   : > { %v194_v28 = vor.u32 1.1754944e-38, %v193_v20  ;;  %vm192_vm5 = vcmp.eq.f32.partialorder %v191_v23, 8.507059e+37 }
  0x2b   : > { %v217_v38 = vor.u32 1.1754944e-38, %v216_v31  ;;  %vm215_vm7 = vcmp.eq.f32.partialorder %v214_v34, 8.507059e+37 }
  0x2e   : > { %v322_v16 = vpop.eup %321 }
  0x2f   : > { %v324_v17 = vpop.eup %323  ;;  %v183_v18 = vmul.f32 %v322_v16, %v181_v14  ;;  %vm188_vm1 = vweird.f32 %v322_v16 }
  0x30   : > { %v206_v21 = vmul.f32 %v324_v17, %v204_v15  ;;  %vm189_vm2 = vmor %vm187_vm0, %vm188_vm1  ;;  %vm211_vm4 = vweird.f32 %v324_v17 }
  0x31   : > { %v184_v22 = vsub.f32 1.0, %v183_v18  ;;  %vm212_vm6 = vmor %vm210_vm3, %vm211_vm4 }
  0x32   : > { %v207_v24 = vsub.f32 1.0, %v206_v21 }
  0x33   : > { %v185_v25 = vmul.f32 %v322_v16, %v184_v22 }
  0x34   : > { %v208_v29 = vmul.f32 %v324_v17, %v207_v24 }
  0x35   : > { %v186_v30 = vadd.f32 %v322_v16, %v185_v25 }
  0x36   : > { %v209_v33 = vadd.f32 %v324_v17, %v208_v29 }
  0x37   : > { %v190_v35 = vsel %vm189_vm2, %v322_v16, %v186_v30 }
  0x38   : > { %v195_v37 = vsel %vm192_vm5, %v194_v28, %v190_v35  ;;  %v213_v40 = vsel %vm212_vm6, %v324_v17, %v209_v33 }
  0x39   : > { %v225_v39 = vmul.f32 %v224_v32, %v195_v37  ;;  %v218_v42 = vsel %vm215_vm7, %v217_v38, %v213_v40 }
  0x3a   : > { %v228_v43 = vsub.f32 1.0, %v218_v42 }
  0x3b   : > { %v226_v41 = vadd.f32 %v225_v39, %v223_v36 }
  0x3d   : > { %325 = vtanh.f32 %v226_v41 }
  0x43   : > { %v326_v44 = vpop.eup %325 }
  0x44   : > { %v229_v45 = vmul.f32 %v326_v44, %v228_v43 }
  0x46   : > { %230 = vst [vmem:[%s171_s28] sm:$0xff] %v229_v45 }
  0x47 PF: > { %s21_s16 = sadd.s32 1, %s347_s16  }
  0x48   : > { %p18_p5 = scmp.ge.s32.totalorder %s21_s16, 4  }
  0x4a   :  { %20 = sbr.rel (!%p18_p5) target bundleno = 7 (0x7), region = 61 }

</bundles_post_ra>
